<compile_context>
chip_gen: v7x
topology: tpu7x:2x2x1
jax: 0.10.0
libtpu: 0.0.40
codegen_flags: <defaults>
</compile_context>

<pallas_src>
import math
import numpy as np
import jax
import jax.numpy as jnp
from jax import lax
from jax.experimental import pallas as pl
from jax.experimental.pallas import tpu as pltpu

# ---- model config (small, consistent with the module) ----
DIM = 32
N_HEADS = 4
HEAD_DIM = DIM // N_HEADS
MLP_RATIO = 4.0
HIDDEN = int(DIM * MLP_RATIO)      # 128
BATCH = 2
SEQ = 8
EPS = 1e-5                         # torch LayerNorm default
ROPE_BASE = 10000.0
NEG_INF = -1e30                    # finite "minus infinity" for masking

BS = BATCH * SEQ                   # 16 tokens
D2 = 2 * DIM                       # 64 (packed q|k width)
BHS = BATCH * N_HEADS * SEQ        # 64 (block-diag key axis)

# ---- f32 slab layout (rows); width F_COLS, all items at column 0 ----
F_LN1W, F_LN1B, F_LN2W, F_LN2B, F_BO, F_BOUT, F_QKW, F_QKB = range(8)
F_COS = 8                          # (BS, 2D)
F_SIN = F_COS + BS                 # 24
F_BIAS = F_SIN + BS                # 40  (BS, BHS) causal + batch-block bias
F_HM = F_BIAS + BS                 # 56  (BHS, D) per-head column mask
F_ROWS = F_HM + BHS                # 120
F_COLS = max(D2, BHS)              # 64

# ---- bf16 slab layout (rows); width W_COLS, all items at column 0 ----
W_QKV = 0                          # (D, 3D)  fused [Wq|Wk|Wv]
W_AVG = W_QKV + DIM                # 32  (2D, 2D) kron(I_2H, 1/HD)
W_ROT = W_AVG + D2                 # 96  (2D, 2D) kron(I_2H, rotate-half)
W_REP = W_ROT + D2                 # 160 (BHS, BS) replication matrix
W_DEN = W_REP + BHS                # 224 (BHS, BHS) kron(I_BH, ones(S,S))
W_WO = W_DEN + BHS                 # 288 (D, D)
W_WH = W_WO + DIM                  # 320 (D, 2*HIDDEN)
W_WOUT = W_WH + DIM                # 352 (HIDDEN, D)
W_ROWS = W_WOUT + HIDDEN           # 480
W_COLS = 2 * HIDDEN                # 256


def _layernorm(x, w, b):
    # PyTorch LayerNorm: biased variance, eps inside sqrt.
    mu = jnp.mean(x, axis=-1, keepdims=True)
    var = jnp.mean((x - mu) ** 2, axis=-1, keepdims=True)
    return (x - mu) * lax.rsqrt(var + EPS) * w + b


def neo_block_kernel(x_ref, f_ref, w_ref, o_ref):
    bf16 = jnp.bfloat16
    f32 = jnp.float32

    x = x_ref[...]                                            # (BS, D) f32

    # ---- static, column-0 aligned slab slices ----
    ln1w = f_ref[F_LN1W:F_LN1W + 1, 0:DIM]
    ln1b = f_ref[F_LN1B:F_LN1B + 1, 0:DIM]
    ln2w = f_ref[F_LN2W:F_LN2W + 1, 0:DIM]
    ln2b = f_ref[F_LN2B:F_LN2B + 1, 0:DIM]
    bo = f_ref[F_BO:F_BO + 1, 0:DIM]
    bout = f_ref[F_BOUT:F_BOUT + 1, 0:DIM]
    wqk = f_ref[F_QKW:F_QKW + 1, 0:D2]                        # scale folded into q half
    bqk = f_ref[F_QKB:F_QKB + 1, 0:D2]
    cos2 = f_ref[F_COS:F_COS + BS, 0:D2]
    sin2 = f_ref[F_SIN:F_SIN + BS, 0:D2]
    bias = f_ref[F_BIAS:F_BIAS + BS, 0:BHS]
    hm = f_ref[F_HM:F_HM + BHS, 0:DIM]

    wqkv = w_ref[W_QKV:W_QKV + DIM, 0:3 * DIM]
    avg2 = w_ref[W_AVG:W_AVG + D2, 0:D2]
    rot2 = w_ref[W_ROT:W_ROT + D2, 0:D2]
    rmat = w_ref[W_REP:W_REP + BHS, 0:BS]
    dmat = w_ref[W_DEN:W_DEN + BHS, 0:BHS]
    wo = w_ref[W_WO:W_WO + DIM, 0:DIM]
    wh = w_ref[W_WH:W_WH + DIM, 0:2 * HIDDEN]
    wout = w_ref[W_WOUT:W_WOUT + HIDDEN, 0:DIM]

    # ------------- pre-norm + fused QKV projection -------------
    xn = _layernorm(x, ln1w, ln1b)
    qkv = jnp.dot(xn.astype(bf16), wqkv, preferred_element_type=f32)   # (BS, 3D)
    qk = qkv[:, 0:D2]                                         # packed [q|k]
    v = qkv[:, D2:3 * DIM]                                    # (BS, D)

    # ------- packed per-head LayerNorm on q|k (block-avg matmuls) -------
    mu = jnp.dot(qk.astype(bf16), avg2, preferred_element_type=f32)
    msq = jnp.dot((qk * qk).astype(bf16), avg2, preferred_element_type=f32)
    var = msq - mu * mu                                       # biased variance
    qkn = (qk - mu) * lax.rsqrt(var + EPS) * wqk + bqk        # q half pre-scaled

    # ------- packed rotary: t*cos + (t @ kron(I_2H, P))*sin -------
    rot = jnp.dot(qkn.astype(bf16), rot2, preferred_element_type=f32)
    qkr = qkn * cos2 + rot * sin2

    q = qkr[:, 0:DIM]                                         # (BS, D), already scaled
    k = qkr[:, DIM:D2]                                        # (BS, D)

    # ------- block-diagonal (batch x head) K / V slabs via replication matmul -------
    k_rep = jnp.dot(rmat, k.astype(bf16), preferred_element_type=f32)  # (BHS, D)
    v_rep = jnp.dot(rmat, v.astype(bf16), preferred_element_type=f32)
    k_slab = (k_rep * hm).astype(bf16)                        # zero non-head columns
    v_slab = (v_rep * hm).astype(bf16)

    # ------- attention for the whole batch in 3 matmuls -------
    scores = jnp.dot(q.astype(bf16), k_slab.T,
                     preferred_element_type=f32) + bias       # (BS, BHS)
    m = jnp.max(scores, axis=-1, keepdims=True)               # shared row max (cancels)
    e = jnp.exp(scores - m)                                   # masked entries -> 0
    denom = jnp.dot(e.astype(bf16), dmat, preferred_element_type=f32)
    denom = jnp.where(denom == 0.0, 1.0, denom)               # fully-masked blocks
    p = e * pl.reciprocal(denom, approx=True)
    # attn_dropout(p=0.1) -> identity (inference)
    attn = jnp.dot(p.astype(bf16), v_slab, preferred_element_type=f32)  # (BS, D)

    attn = jnp.dot(attn.astype(bf16), wo, preferred_element_type=f32) + bo
    x1 = x + attn

    # ------------------- pre-norm SwiGLU MLP -------------------
    xn2 = _layernorm(x1, ln2w, ln2b)
    h2 = jnp.dot(xn2.astype(bf16), wh, preferred_element_type=f32)     # (BS, 2*HIDDEN)
    hid = h2[:, 0:HIDDEN]
    gate = h2[:, HIDDEN:2 * HIDDEN]                           # lane-128 aligned split
    act = hid * (gate * jax.nn.sigmoid(gate))                 # silu(gate) * hidden
    mlp = jnp.dot(act.astype(bf16), wout, preferred_element_type=f32) + bout
    o_ref[...] = x1 + mlp


def neo_transformer_block(x, fslab, wslab):
    B, S, D = x.shape
    xf = x.reshape(B * S, D)
    out = pl.pallas_call(
        neo_block_kernel,
        out_shape=jax.ShapeDtypeStruct((B * S, D), jnp.float32),
        grid=(1,),
        in_specs=[pl.BlockSpec(xf.shape, lambda i: (0, 0)),
                  pl.BlockSpec(fslab.shape, lambda i: (0, 0)),
                  pl.BlockSpec(wslab.shape, lambda i: (0, 0))],
        out_specs=pl.BlockSpec((B * S, D), lambda i: (0, 0)),
        compiler_params=pltpu.CompilerParams(dimension_semantics=("arbitrary",)),
    )(xf, fslab, wslab)
    return out.reshape(B, S, D)


# ---------------- host-side parameter packing ----------------
def make_rotary_cache(seq_len, dim):
    pos = np.arange(seq_len, dtype=np.float32)[:, None]
    dim_idx = np.arange(0, dim, 2, dtype=np.float32) / dim
    theta = pos * np.exp(-dim_idx * math.log(ROPE_BASE))          # (S, dim/2)
    cos = np.repeat(np.cos(theta), 2, axis=1).astype(np.float32)  # repeat_interleave
    sin = np.repeat(np.sin(theta), 2, axis=1).astype(np.float32)
    return cos, sin                                               # (S, dim)


def make_rotate_half_matrix(dim):
    # rotate_half(x) = cat([-x[..., 1::2], x[..., ::2]], -1)  ==  x @ P
    P = np.zeros((dim, dim), np.float32)
    half = dim // 2
    for j in range(half):
        P[2 * j + 1, j] = -1.0
    for j in range(half, dim):
        P[2 * (j - half), j] = 1.0
    return P


def build_packed_params(raw):
    (ln1w, ln1b, wq_t, wk_t, wv_t, qnw, qnb, knw, knb,
     wo_t, bo, ln2w, ln2b, wh_t, wout_t, bout) = [np.asarray(a, np.float32) for a in raw]
    scale = 1.0 / math.sqrt(HEAD_DIM)

    # ---------- f32 slab ----------
    F = np.zeros((F_ROWS, F_COLS), np.float32)
    F[F_LN1W, :DIM] = ln1w
    F[F_LN1B, :DIM] = ln1b
    F[F_LN2W, :DIM] = ln2w
    F[F_LN2B, :DIM] = ln2b
    F[F_BO, :DIM] = bo
    F[F_BOUT, :DIM] = bout
    # packed qk-norm affine; attention scale folded into the q half
    F[F_QKW, :D2] = np.concatenate([np.tile(qnw, N_HEADS) * scale, np.tile(knw, N_HEADS)])
    F[F_QKB, :D2] = np.concatenate([np.tile(qnb, N_HEADS) * scale, np.tile(knb, N_HEADS)])
    cos_hd, sin_hd = make_rotary_cache(SEQ, HEAD_DIM)             # (S, HD)
    F[F_COS:F_COS + BS, :D2] = np.tile(np.tile(cos_hd, (1, 2 * N_HEADS)), (BATCH, 1))
    F[F_SIN:F_SIN + BS, :D2] = np.tile(np.tile(sin_hd, (1, 2 * N_HEADS)), (BATCH, 1))
    # causal + cross-batch mask bias, key axis r = b*H*S + h*S + s
    bias = np.full((BS, BHS), NEG_INF, np.float32)
    for b in range(BATCH):
        for t in range(SEQ):
            for h in range(N_HEADS):
                r0 = b * N_HEADS * SEQ + h * SEQ
                bias[b * SEQ + t, r0:r0 + t + 1] = 0.0
    F[F_BIAS:F_BIAS + BS, :BHS] = bias
    # per-head column mask for the block-diagonal K/V slabs
    hm = np.zeros((BHS, DIM), np.float32)
    for b in range(BATCH):
        for h in range(N_HEADS):
            r0 = b * N_HEADS * SEQ + h * SEQ
            hm[r0:r0 + SEQ, h * HEAD_DIM:(h + 1) * HEAD_DIM] = 1.0
    F[F_HM:F_HM + BHS, :DIM] = hm

    # ---------- bf16 slab (all entries either random weights or exact 0/+-1/(1/HD)) ----------
    W = np.zeros((W_ROWS, W_COLS), np.float32)
    W[W_QKV:W_QKV + DIM, 0:3 * DIM] = np.concatenate([wq_t, wk_t, wv_t], axis=1)
    eye2h = np.eye(2 * N_HEADS, dtype=np.float32)
    W[W_AVG:W_AVG + D2, 0:D2] = np.kron(
        eye2h, np.full((HEAD_DIM, HEAD_DIM), 1.0 / HEAD_DIM, np.float32))
    W[W_ROT:W_ROT + D2, 0:D2] = np.kron(eye2h, make_rotate_half_matrix(HEAD_DIM))
    R = np.zeros((BHS, BS), np.float32)
    for b in range(BATCH):
        for h in range(N_HEADS):
            for s in range(SEQ):
                R[b * N_HEADS * SEQ + h * SEQ + s, b * SEQ + s] = 1.0
    W[W_REP:W_REP + BHS, 0:BS] = R
    W[W_DEN:W_DEN + BHS, 0:BHS] = np.kron(
        np.eye(BATCH * N_HEADS, dtype=np.float32), np.ones((SEQ, SEQ), np.float32))
    W[W_WO:W_WO + DIM, 0:DIM] = wo_t
    W[W_WH:W_WH + DIM, 0:2 * HIDDEN] = wh_t
    W[W_WOUT:W_WOUT + HIDDEN, 0:DIM] = wout_t

    return jnp.asarray(F, jnp.float32), jnp.asarray(W).astype(jnp.bfloat16)


# ---------------- pure-JAX f32 reference (faithful to the torch module) ----------------
def reference(x, raw):
    (ln1w, ln1b, wq_t, wk_t, wv_t, qnw, qnb, knw, knb,
     wo_t, bo, ln2w, ln2b, wh_t, wout_t, bout) = raw
    B, S, D = x.shape

    def ln(a, w, b_):
        mu = jnp.mean(a, -1, keepdims=True)
        var = jnp.mean((a - mu) ** 2, -1, keepdims=True)
        return (a - mu) / jnp.sqrt(var + EPS) * w + b_

    xn = ln(x, ln1w, ln1b)
    q, k, v = xn @ wq_t, xn @ wk_t, xn @ wv_t

    def split(a):
        return a.reshape(B, S, N_HEADS, HEAD_DIM).transpose(0, 2, 1, 3)

    q, k, v = split(q), split(k), split(v)
    q, k = ln(q, qnw, qnb), ln(k, knw, knb)

    cos_hd, sin_hd = make_rotary_cache(S, HEAD_DIM)
    cos, sin = jnp.asarray(cos_hd)[None, None], jnp.asarray(sin_hd)[None, None]

    def rot_half(a):
        x1, x2 = a[..., ::2], a[..., 1::2]
        return jnp.concatenate([-x2, x1], axis=-1)

    q = q * cos + rot_half(q) * sin
    k = k * cos + rot_half(k) * sin
    scale = 1.0 / math.sqrt(HEAD_DIM)
    scores = scale * jnp.einsum("bhqd,bhkd->bhqk", q, k)
    mask = jnp.tril(jnp.ones((S, S), bool))
    scores = jnp.where(mask[None, None], scores, -jnp.inf)
    w = jax.nn.softmax(scores, axis=-1)
    out = jnp.einsum("bhqk,bhkd->bhqd", w, v)
    out = out.transpose(0, 2, 1, 3).reshape(B, S, D)
    x1 = x + out @ wo_t + bo

    xn2 = ln(x1, ln2w, ln2b)
    h2 = xn2 @ wh_t
    hidden, gate = h2[..., :HIDDEN], h2[..., HIDDEN:]
    return x1 + (jax.nn.silu(gate) * hidden) @ wout_t + bout


if __name__ == "__main__":
    key = jax.random.PRNGKey(0)
    ks = jax.random.split(key, 20)

    x = jax.random.normal(ks[0], (BATCH, SEQ, DIM), jnp.float32)

    # Linear weights stored pre-transposed (in_dim, out_dim).
    wq_t = jax.random.normal(ks[1], (DIM, DIM), jnp.float32) * 0.05
    wk_t = jax.random.normal(ks[2], (DIM, DIM), jnp.float32) * 0.05
    wv_t = jax.random.normal(ks[3], (DIM, DIM), jnp.float32) * 0.05
    wo_t = jax.random.normal(ks[4], (DIM, DIM), jnp.float32) * 0.05
    bo = jax.random.normal(ks[5], (DIM,), jnp.float32) * 0.05
    wh_t = jax.random.normal(ks[6], (DIM, 2 * HIDDEN), jnp.float32) * 0.05
    wout_t = jax.random.normal(ks[7], (HIDDEN, DIM), jnp.float32) * 0.05
    bout = jax.random.normal(ks[8], (DIM,), jnp.float32) * 0.05

    # Non-trivial LayerNorm affines so the test exercises the affine paths.
    ln1w = 1.0 + 0.1 * jax.random.normal(ks[9], (DIM,), jnp.float32)
    ln1b = 0.1 * jax.random.normal(ks[10], (DIM,), jnp.float32)
    ln2w = 1.0 + 0.1 * jax.random.normal(ks[11], (DIM,), jnp.float32)
    ln2b = 0.1 * jax.random.normal(ks[12], (DIM,), jnp.float32)
    qnw = 1.0 + 0.1 * jax.random.normal(ks[13], (HEAD_DIM,), jnp.float32)
    qnb = 0.1 * jax.random.normal(ks[14], (HEAD_DIM,), jnp.float32)
    knw = 1.0 + 0.1 * jax.random.normal(ks[15], (HEAD_DIM,), jnp.float32)
    knb = 0.1 * jax.random.normal(ks[16], (HEAD_DIM,), jnp.float32)

    raw = [ln1w, ln1b, wq_t, wk_t, wv_t, qnw, qnb, knw, knb,
           wo_t, bo, ln2w, ln2b, wh_t, wout_t, bout]

    fslab, wslab = build_packed_params(raw)
    out = jax.block_until_ready(neo_transformer_block(x, fslab, wslab))

    ref = jax.block_until_ready(reference(x, raw))
    # bf16 MXU operands => looser tolerance than a pure-f32 kernel.
    np.testing.assert_allclose(np.asarray(out), np.asarray(ref), rtol=2e-2, atol=2e-2)

    print("KERNEL_OK")
</pallas_src>

<mosaic_0001>
module attributes {stable_mosaic.version = 11 : i64} {
  func.func @neo_block_kernel(%arg0: i32, %arg1: memref<16x32xf32, #tpu.memory_space<vmem>>, %arg2: memref<120x64xf32, #tpu.memory_space<vmem>>, %arg3: memref<480x256xbf16, #tpu.memory_space<vmem>>, %arg4: memref<16x32xf32, #tpu.memory_space<vmem>>) attributes {dimension_semantics = [#tpu.dimension_semantics<arbitrary>], iteration_bounds = array<i64: 1>, scalar_prefetch = 0 : i64, scratch_operands = 0 : i64, tpu.core_type = #tpu.core_type<tc>, window_params = [{pipeline_mode = #tpu.pipeline_mode<synchronous>, transform_indices = @transform_0, window_bounds = array<i64: 16, 32>}, {pipeline_mode = #tpu.pipeline_mode<synchronous>, transform_indices = @transform_1, window_bounds = array<i64: 120, 64>}, {pipeline_mode = #tpu.pipeline_mode<synchronous>, transform_indices = @transform_2, window_bounds = array<i64: 480, 256>}, {pipeline_mode = #tpu.pipeline_mode<synchronous>, transform_indices = @transform_3, window_bounds = array<i64: 16, 32>}]} {
    %c0 = arith.constant 0 : index
    %c0_0 = arith.constant 0 : index
    %0 = vector.load %arg1[%c0, %c0_0] : memref<16x32xf32, #tpu.memory_space<vmem>>, vector<16x32xf32>
    %c0_1 = arith.constant 0 : index
    %c0_2 = arith.constant 0 : index
    %1 = vector.load %arg2[%c0_1, %c0_2] : memref<120x64xf32, #tpu.memory_space<vmem>>, vector<1x32xf32>
    %c1 = arith.constant 1 : index
    %c0_3 = arith.constant 0 : index
    %2 = vector.load %arg2[%c1, %c0_3] : memref<120x64xf32, #tpu.memory_space<vmem>>, vector<1x32xf32>
    %c2 = arith.constant 2 : index
    %c0_4 = arith.constant 0 : index
    %3 = vector.load %arg2[%c2, %c0_4] : memref<120x64xf32, #tpu.memory_space<vmem>>, vector<1x32xf32>
    %c3 = arith.constant 3 : index
    %c0_5 = arith.constant 0 : index
    %4 = vector.load %arg2[%c3, %c0_5] : memref<120x64xf32, #tpu.memory_space<vmem>>, vector<1x32xf32>
    %c4 = arith.constant 4 : index
    %c0_6 = arith.constant 0 : index
    %5 = vector.load %arg2[%c4, %c0_6] : memref<120x64xf32, #tpu.memory_space<vmem>>, vector<1x32xf32>
    %c5 = arith.constant 5 : index
    %c0_7 = arith.constant 0 : index
    %6 = vector.load %arg2[%c5, %c0_7] : memref<120x64xf32, #tpu.memory_space<vmem>>, vector<1x32xf32>
    %c6 = arith.constant 6 : index
    %c0_8 = arith.constant 0 : index
    %7 = vector.load %arg2[%c6, %c0_8] : memref<120x64xf32, #tpu.memory_space<vmem>>, vector<1x64xf32>
    %c7 = arith.constant 7 : index
    %c0_9 = arith.constant 0 : index
    %8 = vector.load %arg2[%c7, %c0_9] : memref<120x64xf32, #tpu.memory_space<vmem>>, vector<1x64xf32>
    %c8 = arith.constant 8 : index
    %c0_10 = arith.constant 0 : index
    %9 = vector.load %arg2[%c8, %c0_10] : memref<120x64xf32, #tpu.memory_space<vmem>>, vector<16x64xf32>
    %c24 = arith.constant 24 : index
    %c0_11 = arith.constant 0 : index
    %10 = vector.load %arg2[%c24, %c0_11] : memref<120x64xf32, #tpu.memory_space<vmem>>, vector<16x64xf32>
    %c40 = arith.constant 40 : index
    %c0_12 = arith.constant 0 : index
    %11 = vector.load %arg2[%c40, %c0_12] : memref<120x64xf32, #tpu.memory_space<vmem>>, vector<16x64xf32>
    %c56 = arith.constant 56 : index
    %c0_13 = arith.constant 0 : index
    %12 = vector.load %arg2[%c56, %c0_13] : memref<120x64xf32, #tpu.memory_space<vmem>>, vector<64x32xf32>
    %c0_14 = arith.constant 0 : index
    %c0_15 = arith.constant 0 : index
    %13 = vector.load %arg3[%c0_14, %c0_15] : memref<480x256xbf16, #tpu.memory_space<vmem>>, vector<32x96xbf16>
    %c32 = arith.constant 32 : index
    %c0_16 = arith.constant 0 : index
    %14 = vector.load %arg3[%c32, %c0_16] : memref<480x256xbf16, #tpu.memory_space<vmem>>, vector<64x64xbf16>
    %c96 = arith.constant 96 : index
    %c0_17 = arith.constant 0 : index
    %15 = vector.load %arg3[%c96, %c0_17] : memref<480x256xbf16, #tpu.memory_space<vmem>>, vector<64x64xbf16>
    %c160 = arith.constant 160 : index
    %c0_18 = arith.constant 0 : index
    %16 = vector.load %arg3[%c160, %c0_18] : memref<480x256xbf16, #tpu.memory_space<vmem>>, vector<64x16xbf16>
    %c224 = arith.constant 224 : index
    %c0_19 = arith.constant 0 : index
    %17 = vector.load %arg3[%c224, %c0_19] : memref<480x256xbf16, #tpu.memory_space<vmem>>, vector<64x64xbf16>
    %c288 = arith.constant 288 : index
    %c0_20 = arith.constant 0 : index
    %18 = vector.load %arg3[%c288, %c0_20] : memref<480x256xbf16, #tpu.memory_space<vmem>>, vector<32x32xbf16>
    %c320 = arith.constant 320 : index
    %c0_21 = arith.constant 0 : index
    %19 = vector.load %arg3[%c320, %c0_21] : memref<480x256xbf16, #tpu.memory_space<vmem>>, vector<32x256xbf16>
    %c352 = arith.constant 352 : index
    %c0_22 = arith.constant 0 : index
    %20 = vector.load %arg3[%c352, %c0_22] : memref<480x256xbf16, #tpu.memory_space<vmem>>, vector<128x32xbf16>
    %cst = arith.constant dense<0.000000e+00> : vector<16xf32>
    %21 = vector.multi_reduction <add>, %0, %cst [1] : vector<16x32xf32> to vector<16xf32>
    %22 = vector.shape_cast %21 : vector<16xf32> to vector<16x1xf32>
    %cst_23 = arith.constant 3.200000e+01 : f32
    %23 = vector.broadcast %cst_23 : f32 to vector<16x1xf32>
    %24 = arith.divf %22, %23 : vector<16x1xf32>
    %25 = vector.broadcast %24 : vector<16x1xf32> to vector<16x32xf32>
    %26 = arith.subf %0, %25 : vector<16x32xf32>
    %27 = arith.mulf %26, %26 : vector<16x32xf32>
    %cst_24 = arith.constant dense<0.000000e+00> : vector<16xf32>
    %28 = vector.multi_reduction <add>, %27, %cst_24 [1] : vector<16x32xf32> to vector<16xf32>
    %29 = vector.shape_cast %28 : vector<16xf32> to vector<16x1xf32>
    %cst_25 = arith.constant 3.200000e+01 : f32
    %30 = vector.broadcast %cst_25 : f32 to vector<16x1xf32>
    %31 = arith.divf %29, %30 : vector<16x1xf32>
    %32 = vector.broadcast %24 : vector<16x1xf32> to vector<16x32xf32>
    %33 = arith.subf %0, %32 : vector<16x32xf32>
    %cst_26 = arith.constant 9.99999974E-6 : f32
    %34 = vector.broadcast %cst_26 : f32 to vector<16x1xf32>
    %35 = arith.addf %31, %34 : vector<16x1xf32>
    %36 = math.rsqrt %35 : vector<16x1xf32>
    %37 = vector.broadcast %36 : vector<16x1xf32> to vector<16x32xf32>
    %38 = arith.mulf %33, %37 : vector<16x32xf32>
    %39 = vector.broadcast %1 : vector<1x32xf32> to vector<16x32xf32>
    %40 = arith.mulf %38, %39 : vector<16x32xf32>
    %41 = vector.broadcast %2 : vector<1x32xf32> to vector<16x32xf32>
    %42 = arith.addf %40, %41 : vector<16x32xf32>
    %43 = arith.truncf %42 : vector<16x32xf32> to vector<16x32xbf16>
    %cst_27 = arith.constant dense<0.000000e+00> : vector<16x96xf32>
    %44 = tpu.matmul %43, %13, %cst_27 {dimension_numbers = #tpu.dot_dimension_numbers<[1], [0], [0], [1], [0, 0, 1, 1], [], []>} : vector<16x32xbf16>, vector<32x96xbf16>, vector<16x96xf32> -> vector<16x96xf32>
    %45 = vector.extract_strided_slice %44 {offsets = [0, 0], sizes = [16, 64], strides = [1, 1]} : vector<16x96xf32> to vector<16x64xf32>
    %46 = vector.extract_strided_slice %44 {offsets = [0, 64], sizes = [16, 32], strides = [1, 1]} : vector<16x96xf32> to vector<16x32xf32>
    %47 = arith.truncf %45 : vector<16x64xf32> to vector<16x64xbf16>
    %cst_28 = arith.constant dense<0.000000e+00> : vector<16x64xf32>
    %48 = tpu.matmul %47, %14, %cst_28 {dimension_numbers = #tpu.dot_dimension_numbers<[1], [0], [0], [1], [0, 0, 1, 1], [], []>} : vector<16x64xbf16>, vector<64x64xbf16>, vector<16x64xf32> -> vector<16x64xf32>
    %49 = arith.mulf %45, %45 : vector<16x64xf32>
    %50 = arith.truncf %49 : vector<16x64xf32> to vector<16x64xbf16>
    %cst_29 = arith.constant dense<0.000000e+00> : vector<16x64xf32>
    %51 = tpu.matmul %50, %14, %cst_29 {dimension_numbers = #tpu.dot_dimension_numbers<[1], [0], [0], [1], [0, 0, 1, 1], [], []>} : vector<16x64xbf16>, vector<64x64xbf16>, vector<16x64xf32> -> vector<16x64xf32>
    %52 = arith.mulf %48, %48 : vector<16x64xf32>
    %53 = arith.subf %51, %52 : vector<16x64xf32>
    %54 = arith.subf %45, %48 : vector<16x64xf32>
    %cst_30 = arith.constant 9.99999974E-6 : f32
    %55 = vector.broadcast %cst_30 : f32 to vector<16x64xf32>
    %56 = arith.addf %53, %55 : vector<16x64xf32>
    %57 = math.rsqrt %56 : vector<16x64xf32>
    %58 = arith.mulf %54, %57 : vector<16x64xf32>
    %59 = vector.broadcast %7 : vector<1x64xf32> to vector<16x64xf32>
    %60 = arith.mulf %58, %59 : vector<16x64xf32>
    %61 = vector.broadcast %8 : vector<1x64xf32> to vector<16x64xf32>
    %62 = arith.addf %60, %61 : vector<16x64xf32>
    %63 = arith.truncf %62 : vector<16x64xf32> to vector<16x64xbf16>
    %cst_31 = arith.constant dense<0.000000e+00> : vector<16x64xf32>
    %64 = tpu.matmul %63, %15, %cst_31 {dimension_numbers = #tpu.dot_dimension_numbers<[1], [0], [0], [1], [0, 0, 1, 1], [], []>} : vector<16x64xbf16>, vector<64x64xbf16>, vector<16x64xf32> -> vector<16x64xf32>
    %65 = arith.mulf %62, %9 : vector<16x64xf32>
    %66 = arith.mulf %64, %10 : vector<16x64xf32>
    %67 = arith.addf %65, %66 : vector<16x64xf32>
    %68 = vector.extract_strided_slice %67 {offsets = [0, 0], sizes = [16, 32], strides = [1, 1]} : vector<16x64xf32> to vector<16x32xf32>
    %69 = vector.extract_strided_slice %67 {offsets = [0, 32], sizes = [16, 32], strides = [1, 1]} : vector<16x64xf32> to vector<16x32xf32>
    %70 = arith.truncf %69 : vector<16x32xf32> to vector<16x32xbf16>
    %cst_32 = arith.constant dense<0.000000e+00> : vector<64x32xf32>
    %71 = tpu.matmul %16, %70, %cst_32 {dimension_numbers = #tpu.dot_dimension_numbers<[1], [0], [0], [1], [0, 0, 1, 1], [], []>} : vector<64x16xbf16>, vector<16x32xbf16>, vector<64x32xf32> -> vector<64x32xf32>
    %72 = arith.truncf %46 : vector<16x32xf32> to vector<16x32xbf16>
    %cst_33 = arith.constant dense<0.000000e+00> : vector<64x32xf32>
    %73 = tpu.matmul %16, %72, %cst_33 {dimension_numbers = #tpu.dot_dimension_numbers<[1], [0], [0], [1], [0, 0, 1, 1], [], []>} : vector<64x16xbf16>, vector<16x32xbf16>, vector<64x32xf32> -> vector<64x32xf32>
    %74 = arith.mulf %71, %12 : vector<64x32xf32>
    %75 = arith.truncf %74 : vector<64x32xf32> to vector<64x32xbf16>
    %76 = arith.mulf %73, %12 : vector<64x32xf32>
    %77 = arith.truncf %76 : vector<64x32xf32> to vector<64x32xbf16>
    %78 = arith.truncf %68 : vector<16x32xf32> to vector<16x32xbf16>
    %79 = tpu.transpose %75, [1, 0] : vector<64x32xbf16> -> vector<32x64xbf16>
    %cst_34 = arith.constant dense<0.000000e+00> : vector<16x64xf32>
    %80 = tpu.matmul %78, %79, %cst_34 {dimension_numbers = #tpu.dot_dimension_numbers<[1], [0], [0], [1], [0, 0, 1, 1], [], []>} : vector<16x32xbf16>, vector<32x64xbf16>, vector<16x64xf32> -> vector<16x64xf32>
    %81 = arith.addf %80, %11 : vector<16x64xf32>
    %cst_35 = arith.constant dense<0xFF800000> : vector<16xf32>
    %82 = vector.multi_reduction <maximumf>, %81, %cst_35 [1] : vector<16x64xf32> to vector<16xf32>
    %83 = vector.shape_cast %82 : vector<16xf32> to vector<16x1xf32>
    %84 = vector.broadcast %83 : vector<16x1xf32> to vector<16x64xf32>
    %85 = arith.subf %81, %84 : vector<16x64xf32>
    %86 = math.exp %85 : vector<16x64xf32>
    %87 = arith.truncf %86 : vector<16x64xf32> to vector<16x64xbf16>
    %cst_36 = arith.constant dense<0.000000e+00> : vector<16x64xf32>
    %88 = tpu.matmul %87, %17, %cst_36 {dimension_numbers = #tpu.dot_dimension_numbers<[1], [0], [0], [1], [0, 0, 1, 1], [], []>} : vector<16x64xbf16>, vector<64x64xbf16>, vector<16x64xf32> -> vector<16x64xf32>
    %cst_37 = arith.constant 0.000000e+00 : f32
    %89 = vector.broadcast %cst_37 : f32 to vector<16x64xf32>
    %90 = arith.cmpf oeq, %88, %89 : vector<16x64xf32>
    %cst_38 = arith.constant 1.000000e+00 : f32
    %91 = vector.broadcast %cst_38 : f32 to vector<16x64xf32>
    %92 = arith.select %90, %91, %88 : vector<16x64xi1>, vector<16x64xf32>
    %93 = tpu.reciprocal %92 {approx = true} : vector<16x64xf32> -> vector<16x64xf32>
    %94 = arith.mulf %86, %93 : vector<16x64xf32>
    %95 = arith.truncf %94 : vector<16x64xf32> to vector<16x64xbf16>
    %cst_39 = arith.constant dense<0.000000e+00> : vector<16x32xf32>
    %96 = tpu.matmul %95, %77, %cst_39 {dimension_numbers = #tpu.dot_dimension_numbers<[1], [0], [0], [1], [0, 0, 1, 1], [], []>} : vector<16x64xbf16>, vector<64x32xbf16>, vector<16x32xf32> -> vector<16x32xf32>
    %97 = arith.truncf %96 : vector<16x32xf32> to vector<16x32xbf16>
    %cst_40 = arith.constant dense<0.000000e+00> : vector<16x32xf32>
    %98 = tpu.matmul %97, %18, %cst_40 {dimension_numbers = #tpu.dot_dimension_numbers<[1], [0], [0], [1], [0, 0, 1, 1], [], []>} : vector<16x32xbf16>, vector<32x32xbf16>, vector<16x32xf32> -> vector<16x32xf32>
    %99 = vector.broadcast %5 : vector<1x32xf32> to vector<16x32xf32>
    %100 = arith.addf %98, %99 : vector<16x32xf32>
    %101 = arith.addf %0, %100 : vector<16x32xf32>
    %cst_41 = arith.constant dense<0.000000e+00> : vector<16xf32>
    %102 = vector.multi_reduction <add>, %101, %cst_41 [1] : vector<16x32xf32> to vector<16xf32>
    %103 = vector.shape_cast %102 : vector<16xf32> to vector<16x1xf32>
    %cst_42 = arith.constant 3.200000e+01 : f32
    %104 = vector.broadcast %cst_42 : f32 to vector<16x1xf32>
    %105 = arith.divf %103, %104 : vector<16x1xf32>
    %106 = vector.broadcast %105 : vector<16x1xf32> to vector<16x32xf32>
    %107 = arith.subf %101, %106 : vector<16x32xf32>
    %108 = arith.mulf %107, %107 : vector<16x32xf32>
    %cst_43 = arith.constant dense<0.000000e+00> : vector<16xf32>
    %109 = vector.multi_reduction <add>, %108, %cst_43 [1] : vector<16x32xf32> to vector<16xf32>
    %110 = vector.shape_cast %109 : vector<16xf32> to vector<16x1xf32>
    %cst_44 = arith.constant 3.200000e+01 : f32
    %111 = vector.broadcast %cst_44 : f32 to vector<16x1xf32>
    %112 = arith.divf %110, %111 : vector<16x1xf32>
    %113 = vector.broadcast %105 : vector<16x1xf32> to vector<16x32xf32>
    %114 = arith.subf %101, %113 : vector<16x32xf32>
    %cst_45 = arith.constant 9.99999974E-6 : f32
    %115 = vector.broadcast %cst_45 : f32 to vector<16x1xf32>
    %116 = arith.addf %112, %115 : vector<16x1xf32>
    %117 = math.rsqrt %116 : vector<16x1xf32>
    %118 = vector.broadcast %117 : vector<16x1xf32> to vector<16x32xf32>
    %119 = arith.mulf %114, %118 : vector<16x32xf32>
    %120 = vector.broadcast %3 : vector<1x32xf32> to vector<16x32xf32>
    %121 = arith.mulf %119, %120 : vector<16x32xf32>
    %122 = vector.broadcast %4 : vector<1x32xf32> to vector<16x32xf32>
    %123 = arith.addf %121, %122 : vector<16x32xf32>
    %124 = arith.truncf %123 : vector<16x32xf32> to vector<16x32xbf16>
    %cst_46 = arith.constant dense<0.000000e+00> : vector<16x256xf32>
    %125 = tpu.matmul %124, %19, %cst_46 {dimension_numbers = #tpu.dot_dimension_numbers<[1], [0], [0], [1], [0, 0, 1, 1], [], []>} : vector<16x32xbf16>, vector<32x256xbf16>, vector<16x256xf32> -> vector<16x256xf32>
    %126 = vector.extract_strided_slice %125 {offsets = [0, 0], sizes = [16, 128], strides = [1, 1]} : vector<16x256xf32> to vector<16x128xf32>
    %127 = vector.extract_strided_slice %125 {offsets = [0, 128], sizes = [16, 128], strides = [1, 1]} : vector<16x256xf32> to vector<16x128xf32>
    %128 = arith.negf %127 : vector<16x128xf32>
    %129 = math.exp %128 : vector<16x128xf32>
    %cst_47 = arith.constant 1.000000e+00 : f32
    %130 = vector.broadcast %cst_47 : f32 to vector<16x128xf32>
    %131 = arith.addf %130, %129 : vector<16x128xf32>
    %132 = arith.divf %130, %131 : vector<16x128xf32>
    %133 = arith.mulf %127, %132 : vector<16x128xf32>
    %134 = arith.mulf %126, %133 : vector<16x128xf32>
    %135 = arith.truncf %134 : vector<16x128xf32> to vector<16x128xbf16>
    %cst_48 = arith.constant dense<0.000000e+00> : vector<16x32xf32>
    %136 = tpu.matmul %135, %20, %cst_48 {dimension_numbers = #tpu.dot_dimension_numbers<[1], [0], [0], [1], [0, 0, 1, 1], [], []>} : vector<16x128xbf16>, vector<128x32xbf16>, vector<16x32xf32> -> vector<16x32xf32>
    %137 = vector.broadcast %6 : vector<1x32xf32> to vector<16x32xf32>
    %138 = arith.addf %136, %137 : vector<16x32xf32>
    %139 = arith.addf %101, %138 : vector<16x32xf32>
    %c0_49 = arith.constant 0 : index
    %c0_50 = arith.constant 0 : index
    %140 = vector.load %arg4[%c0_49, %c0_50] : memref<16x32xf32, #tpu.memory_space<vmem>>, vector<16x32xf32>
    tpu.vector_store %arg4[%c0_49, %c0_50], %139 {strides = array<i32>} : memref<16x32xf32, #tpu.memory_space<vmem>>, vector<16x32xf32>,
    return
  }
  func.func @transform_0(%arg0: i32) -> (i32, i32) {
    %c0_i32 = arith.constant 0 : i32
    %c0_i32_0 = arith.constant 0 : i32
    %c0_i32_1 = arith.constant 0 : i32
    return %c0_i32, %c0_i32_0 : i32, i32
  }
  func.func @transform_1(%arg0: i32) -> (i32, i32) {
    %c0_i32 = arith.constant 0 : i32
    %c0_i32_0 = arith.constant 0 : i32
    %c0_i32_1 = arith.constant 0 : i32
    return %c0_i32, %c0_i32_0 : i32, i32
  }
  func.func @transform_2(%arg0: i32) -> (i32, i32) {
    %c0_i32 = arith.constant 0 : i32
    %c0_i32_0 = arith.constant 0 : i32
    %c0_i32_1 = arith.constant 0 : i32
    return %c0_i32, %c0_i32_0 : i32, i32
  }
  func.func @transform_3(%arg0: i32) -> (i32, i32) {
    %c0_i32 = arith.constant 0 : i32
    %c0_i32_0 = arith.constant 0 : i32
    %c0_i32_1 = arith.constant 0 : i32
    return %c0_i32, %c0_i32_0 : i32, i32
  }
}

</mosaic_0001>

<bundles_post_ra>
// kernel: tpu_custom_call.1
= control target key start
LH: loop header
LB: loop body
LE: loop exit
PB: predicated region body
PF: predicated region fallthrough
CT: control target
= control target key end

     0   :  { %8 = vsyncpa [#allocation3], 0  ;;  %s1759_s0 = inlined_call_operand.vmem [shape: f32[16,32], index: 0, kind: input, shape index: {}]   ;;  %s1760_s1 = inlined_call_operand.vmem [shape: f32[120,64], index: 1, kind: input, shape index: {}]   ;;  %s1761_s2 = inlined_call_operand.hbm [shape: bf16[480,256], index: 2, kind: input, shape index: {}]   ;;  %s1762_s3 = inlined_call_operand.hbm [shape: f32[16,32], index: 3, kind: output, shape index: {}]  }
   0x1   :  { %9 = vsyncpa [#allocation4], 0  ;;  %s1473_s12 = smov [#allocation2]   ;;  %s1425_s16 = scalar_lea.hbm %s1761_s2, 7680 }
   0x2   :  { %s19_s13 = sshll.u32 %s1473_s12, 4  ;;  %p1426_p0 = scmp.ne.s32.totalorder %s1761_s2, %s1425_s16  ;;  %s20_s13 = int_to_ptr.vmem [resolvable:$true] %s19_s13 }
   0x3   :  { %p1429_p1 = scmp.lt.u32.totalorder %s1425_s16, %s1761_s2 }
   0x5   :  { %p1431_p2 = pnand %p1429_p1, %p1426_p0 }
   0x7   :  { %1434 = shalt.err (!%p1431_p2)
}
   0x8   :  { %s1435_s21 = scalar_lea.vmem %s20_s13, 7680  ;;  %p1440_p4 = scmp.lt.s32.totalorder %s20_s13, %s20_s13 }
   0x9   :  { %p1436_p3 = scmp.ne.s32.totalorder %s20_s13, %s1435_s21  ;;  %p1441_p5 = scmp.lt.s32.totalorder %s1435_s21, %s1435_s21 }
   0xb   :  { %p1442_p6 = por %p1441_p5, %p1440_p4 }
   0xd   :  { %p1443_p7 = pnand %p1442_p6, %p1436_p3 }
   0xf   :  { %1446 = shalt.err (!%p1443_p7)
}
  0x10   :  { %s1474_s22 = smov 128   ;;  %s1475_s23 = smov 8  }
  0x11   :  { %25 = dma.hbm_to_vmem [thread:$0]  %s1761_s2, 7680, %s20_s13, [#allocation3], %s1474_s22, %s1474_s22, %s1475_s23  }
  0x12   :  { %1469 = dma.done.wait [#allocation3], 7680  }
  0x13   :  { %1470 = vsyncadd [#allocation3], 4294959616  ;;  %vm114_vm0 = vcmask 261120   ;;  %v1520_v0 = vld [vmem:[%s1759_s0] sm:$0xff]  ;;  %v1525_v1 = vld [vmem:[%s1759_s0 + $0x8] sm:$0xff]  ;;  %v1476_v15 = vmov 0.0  }
  0x14   :  { %v115_v2 = vsel %vm114_vm0, %v1520_v0, 0.0  ;;  %v118_v3 = vsel %vm114_vm0, %v1525_v1, 0.0  ;;  %v1363_v14 = vld [vmem:[#allocation2] ss:$8 sps:$4 sm:$0xff]   ;;  %1226 = vmatprep.subr.bf16.mxu0 %v1476_v15  ;;  %1258 = vmatprep.subr.bf16.mxu1 %v1476_v15  ;;  %v1364_v16 = vld [vmem:[#allocation2 + $0x10] ss:$8 sps:$4 sm:$0xff]  }
  0x15   :  { %116 = vadd.xlane.f32.xlu0 %v115_v2  ;;  %1227 = vmatpush3.bf16.msra.mxu0 %v1363_v14  ;;  %vm1477_vm1 = vmmov 0   ;;  %v1112_v25 = vld [vmem:[%s1760_s1] ss:$0 sm:$0xff]  ;;  %v1113_v29 = vld [vmem:[%s1760_s1 + $0x1] ss:$0 sm:$0xff]  ;;  %vm236_vm2 = vcmask 523264  }
  0x16   :  { %1230 = vmatprep.mubr.msk.bf16.mxu0 %vm1477_vm1, %v1476_v15  ;;  %1228 = vmatprep.subr.bf16.mxu0 %v1476_v15  ;;  %v1365_v33 = vld [vmem:[#allocation2 + $0x20] ss:$8 sps:$4 sm:$0xff]   ;;  %v1366_v35 = vld [vmem:[#allocation2 + $0x30] ss:$8 sps:$4 sm:$0xff]   ;;  %vm452_vm3 = vcmask 130048   ;;  %s1478_s17 = smov 96  }
  0x17   :  { %1266 = vmatprep.mubr.msk.bf16.mxu1 %vm1477_vm1, %v1476_v15  ;;  %v1367_v36 = vld [vmem:[#allocation2 + $0x40] ss:$8 sps:$4 sm:$0xff]   ;;  %v1368_v37 = vld [vmem:[#allocation2 + $0x50] ss:$8 sps:$4 sm:$0xff]   ;;  %s1479_s11 = smov 64   ;;  %s1481_s20 = smov [#allocation5]  }
  0x18   :  { %v1369_v46 = vld [vmem:[#allocation2 + $0x60] ss:$8 sps:$4 sm:$0xff]   ;;  %v1370_v47 = vld [vmem:[#allocation2 + $0x70] ss:$8 sps:$4 sm:$0xff]   ;;  %s1100_s21 = sshll.u32 %s1481_s20, 4  ;;  %s1101_s21 = int_to_ptr.vmem [resolvable:$true] %s1100_s21 }
  0x19   :  { %119 = vadd.xlane.f32.xlu0 %v118_v3  ;;  %1229 = vmatpush3.bf16.msra.mxu0 %v1364_v16  ;;  %v1371_v48 = vld [vmem:[#allocation2 + $0x80] ss:$8 sps:$4 sm:$0xff]   ;;  %v1372_v49 = vld [vmem:[#allocation2 + $0x90] ss:$8 sps:$4 sm:$0xff]   ;;  %s1447_s24 = scalar_lea.vmem %s1101_s21, 256  ;;  %p1452_p9 = scmp.lt.s32.totalorder %s1101_s21, %s1101_s21 }
  0x1a   :  { %1234 = vmatprep.subr.bf16.mxu0 %v1476_v15  ;;  %1259 = vmatpush3.bf16.msra.mxu1 %v1369_v46  ;;  %v1373_v16 = vld [vmem:[#allocation2 + $0xa0] ss:$8 sps:$4 sm:$0xff]   ;;  %p1448_p8 = scmp.ne.s32.totalorder %s1101_s21, %s1447_s24  ;;  %p1453_p10 = scmp.lt.s32.totalorder %s1447_s24, %s1447_s24 }
  0x1b   :  { %1260 = vmatprep.subr.bf16.mxu1 %v1476_v15 }
  0x1c   :  { %p1454_p11 = por %p1453_p10, %p1452_p9 }
  0x1e   :  { %1261 = vmatpush3.bf16.msra.mxu1 %v1370_v47  ;;  %p1455_p12 = pnand %p1454_p11, %p1448_p8 }
  0x1f   :  { %1262 = vmatprep.subr.bf16.mxu1 %v1476_v15 }
  0x22   :  { %1263 = vmatpush3.bf16.msra.mxu1 %v1371_v48 }
  0x23   :  { %1264 = vmatprep.subr.bf16.mxu1 %v1476_v15 }
  0x26   :  { %1265 = vmatpush3.bf16.msra.mxu1 %v1372_v49 }
  0xa2   :  { %v117_v4 = vpop.xlane.xlu0 %116 }
  0xa3   :  { %v122_v5 = vmul.f32 0.03125, %v117_v4 }
  0xa5   :  { %v124_v6 = vsub.f32 %v1520_v0, %v122_v5  ;;  %v1123_v5 = vld [vmem:[%s1760_s1 + $0x6] ss:$0 sm:$0xff] }
  0xa6   :  { %v120_v7 = vpop.xlane.xlu0 %119 }
  0xa7   :  { %v123_v8 = vmul.f32 0.03125, %v120_v7  ;;  %v126_v9 = vmul.f32 %v124_v6, %v124_v6 }
  0xa9   :  { %v125_v10 = vsub.f32 %v1525_v1, %v123_v8  ;;  %v128_v11 = vsel %vm114_vm0, %v126_v9, 0.0 }
  0xaa   :  { %129 = vadd.xlane.f32.xlu1 %v128_v11 }
  0xab   :  { %v127_v12 = vmul.f32 %v125_v10, %v125_v10 }
  0xad   :  { %v131_v13 = vsel %vm114_vm0, %v127_v12, 0.0 }
  0xae   :  { %132 = vadd.xlane.f32.xlu1 %v131_v13 }
 0x137   :  { %v130_v17 = vpop.xlane.xlu1 %129 }
 0x138   :  { %v134_v18 = vmul.f32 0.03125, %v130_v17  ;;  %v40_v17 = vld [vmem:[%s1760_s1 + $0x8] sm:$0xff] }
 0x13a   :  { %v136_v19 = vadd.f32 1e-05, %v134_v18  ;;  %v42_v18 = vld [vmem:[%s1760_s1 + $0x18] sm:$0xff] }
 0x13b   :  { %v133_v20 = vpop.xlane.xlu1 %132 }
 0x13c   :  { %1397 = vrsqrt.f32 %v136_v19  ;;  %v135_v21 = vmul.f32 0.03125, %v133_v20  ;;  %v41_v20 = vld [vmem:[%s1760_s1 + $0x10] sm:$0xff] }
 0x13e   :  { %v137_v22 = vadd.f32 1e-05, %v135_v21  ;;  %v43_v21 = vld [vmem:[%s1760_s1 + $0x20] sm:$0xff] }
 0x140   :  { %1399 = vrsqrt.f32 %v137_v22 }
 0x146   :  { %v1398_v23 = vpop.eup %1397 }
 0x147   :  { %v140_v24 = vmul.f32 %v1398_v23, %v124_v6 }
 0x149   :  { %v146_v28 = vmul.f32 %v1112_v25, %v140_v24 }
 0x14a   :  { %v1400_v26 = vpop.eup %1399 }
 0x14b   :  { %v141_v27 = vmul.f32 %v1400_v26, %v125_v10  ;;  %v152_v31 = vadd.f32 %v1113_v29, %v146_v28  ;;  %v1124_v10 = vld [vmem:[%s1760_s1 + $0x7] ss:$0 sm:$0xff] }
 0x14d   :  { %v147_v30 = vmul.f32 %v1112_v25, %v141_v27 }
 0x14f   :  { %v153_v32 = vadd.f32 %v1113_v29, %v147_v30 }
 0x151   :  { %v154_v34 = vpack.c.bf16 %v153_v32, %v152_v31 }
 0x153   :  { %1231 = vmatmul.mubr.msk.bf16.vlgmr.msra.gmra.mrb[0].mxu0 %vm114_vm0, %v154_v34  ;;  %v1592_v34 = vld [vmem:[#allocation2 + $0xc0] ss:$8 sps:$4 sm:$0xff]  }
 0x154   :  { %1235 = vmatpush3.bf16.msra.mxu0 %v1365_v33  ;;  %1242 = vmatprep.mubr.msk.bf16.mxu0 %vm1477_vm1, %v1476_v15 }
 0x155   :  { %1236 = vmatprep.subr.bf16.mxu0 %v1476_v15 }
 0x158   :  { %1237 = vmatpush3.bf16.msra.mxu0 %v1366_v35 }
 0x159   :  { %1238 = vmatprep.subr.bf16.mxu0 %v1476_v15 }
 0x15c   :  { %1239 = vmatpush3.bf16.msra.mxu0 %v1367_v36 }
 0x15d   :  { %1240 = vmatprep.subr.bf16.mxu0 %v1476_v15 }
 0x160   :  { %1241 = vmatpush3.bf16.msra.mxu0 %v1368_v37 }
 0x161   :  { %1246 = vmatprep.subr.bf16.mxu0 %v1476_v15 }
 0x226   :  { %v204_v38 = vpop.f32.mrb[0].mxu0 }
 0x227   :  { %v1232_v39 = vpop.f32.mrb[1].mxu0  ;;  %v281_v41 = vmul.f32 %v204_v38, %v204_v38 }
 0x228   :  { %v207_v40 = vpop.f32.mrb[2].mxu0  ;;  %v1618_v39 = vld [vmem:[%s1760_s1 + $0x38] sm:$0xff] }
 0x229   :  { %v1556_v42 = vpack.c.bf16 %v207_v40, %v204_v38  ;;  %v282_v43 = vmul.f32 %v207_v40, %v207_v40  ;;  %v1233_v44 = vpop.f32.mrb[3].mxu0 }
 0x22b   :  { %v283_v45 = vpack.c.bf16 %v282_v43, %v281_v41  ;;  %1243 = vmatmul.mubr.msk.bf16.vlgmr.msra.gmra.mrb[4].mxu0 %vm236_vm2, %v1556_v42  ;;  %v1623_v41 = vld [vmem:[%s1760_s1 + $0x40] sm:$0xff] }
 0x22c   :  { %1247 = vmatpush3.bf16.msra.mxu0 %v1365_v33  ;;  %1254 = vmatprep.mubr.msk.bf16.mxu0 %vm1477_vm1, %v1476_v15  ;;  %v1590_v33 = vld [vmem:[#allocation2 + $0xb0] ss:$8 sps:$4 sm:$0xff]  }
 0x22d   :  { %1248 = vmatprep.subr.bf16.mxu0 %v1476_v15 }
 0x230   :  { %1249 = vmatpush3.bf16.msra.mxu0 %v1366_v35  ;;  %v1599_v35 = vld [vmem:[#allocation2 + $0xd0] ss:$8 sps:$4 sm:$0xff]  }
 0x231   :  { %1250 = vmatprep.subr.bf16.mxu0 %v1476_v15 }
 0x234   :  { %1251 = vmatpush3.bf16.msra.mxu0 %v1367_v36  ;;  %v1608_v36 = vld [vmem:[%s1760_s1 + $0x48] sm:$0xff] }
 0x235   :  { %1252 = vmatprep.subr.bf16.mxu0 %v1476_v15 }
 0x238   :  { %1253 = vmatpush3.bf16.msra.mxu0 %v1368_v37 }
 0x23b   :  { %1255 = vmatmul.mubr.msk.bf16.vlgmr.msra.gmra.mrb[8].mxu0 %vm236_vm2, %v283_v45 }
 0x23c   :  { %1272 = vmatprep.mubr.msk.bf16.mxu0 %vm452_vm3, %v1373_v16 }
 0x2fe   :  { %v274_v50 = vpop.f32.mrb[4].mxu0 }
 0x2ff   :  { %v332_v51 = vsub.f32 %v204_v38, %v274_v50  ;;  %v1244_v52 = vpop.f32.mrb[5].mxu0  ;;  %v328_v56 = vmul.f32 %v274_v50, %v274_v50  ;;  %v1613_v38 = vld [vmem:[%s1760_s1 + $0x50] sm:$0xff] }
 0x300   :  { %v277_v53 = vpop.f32.mrb[6].mxu0  ;;  %v1637_v52 = vld [vmem:[%s1760_s1 + $0x58] sm:$0xff] }
 0x301   :  { %v333_v54 = vsub.f32 %v207_v40, %v277_v53  ;;  %v1245_v55 = vpop.f32.mrb[7].mxu0  ;;  %v329_v58 = vmul.f32 %v277_v53, %v277_v53 }
 0x302   :  { %v1643_v55 = vld [vmem:[%s1760_s1 + $0x70] sm:$0xff] }
 0x30e   :  { %v321_v57 = vpop.f32.mrb[8].mxu0 }
 0x30f   :  { %v330_v59 = vsub.f32 %v321_v57, %v328_v56  ;;  %v1256_v60 = vpop.f32.mrb[9].mxu0 }
 0x310   :  { %v324_v61 = vpop.f32.mrb[10].mxu0 }
 0x311   :  { %v334_v62 = vadd.f32 1e-05, %v330_v59  ;;  %v331_v63 = vsub.f32 %v324_v61, %v329_v58  ;;  %v1257_v2 = vpop.f32.mrb[11].mxu0  ;;  %v1649_v58 = vld [vmem:[%s1760_s1 + $0x60] sm:$0xff] }
 0x313   :  { %1401 = vrsqrt.f32 %v334_v62  ;;  %v335_v3 = vadd.f32 1e-05, %v331_v63 }
 0x315   :  { %1403 = vrsqrt.f32 %v335_v3 }
 0x31d   :  { %v1402_v4 = vpop.eup %1401 }
 0x31e   :  { %v338_v6 = vmul.f32 %v1402_v4, %v332_v51  ;;  %v1632_v51 = vld [vmem:[%s1760_s1 + $0x68] sm:$0xff] }
 0x31f   :  { %v1404_v7 = vpop.eup %1403 }
 0x320   :  { %v339_v8 = vmul.f32 %v1404_v7, %v333_v54  ;;  %v344_v9 = vmul.f32 %v1123_v5, %v338_v6  ;;  %v44_v7 = vld [vmem:[%s1760_s1 + $0x28] sm:$0xff] }
 0x322   :  { %v345_v11 = vmul.f32 %v1123_v5, %v339_v8  ;;  %v350_v12 = vadd.f32 %v1124_v10, %v344_v9  ;;  %v45_v9 = vld [vmem:[%s1760_s1 + $0x30] sm:$0xff] }
 0x324   :  { %v351_v13 = vadd.f32 %v1124_v10, %v345_v11  ;;  %v421_v22 = vmul.f32 %v350_v12, %v40_v17 }
 0x326   :  { %v352_v14 = vpack.c.bf16 %v351_v13, %v350_v12  ;;  %v422_v27 = vmul.f32 %v351_v13, %v41_v20 }
 0x328   :  { %1267 = vmatmul.mubr.msk.bf16.vlgmr.msra.gmra.mrb[0].mxu1 %vm236_vm2, %v352_v14 }
 0x329   :  { %1282 = vmatprep.mubr.msk.bf16.mxu1 %vm452_vm3, %v1373_v16 }
 0x3fb   :  { %v414_v19 = vpop.f32.mrb[0].mxu1 }
 0x3fc   :  { %v423_v23 = vmul.f32 %v414_v19, %v42_v18  ;;  %v1268_v24 = vpop.f32.mrb[1].mxu1 }
 0x3fd   :  { %v417_v25 = vpop.f32.mrb[2].mxu1  ;;  %v1377_v24 = vld [vmem:[#allocation2 + $0xe0] ss:$8 sps:$4 sm:$0xff]  }
 0x3fe   :  { %v425_v26 = vadd.f32 %v423_v23, %v421_v22  ;;  %v424_v28 = vmul.f32 %v417_v25, %v43_v21  ;;  %v1269_v29 = vpop.f32.mrb[3].mxu1 }
 0x400   :  { %v426_v30 = vadd.f32 %v424_v28, %v422_v27  ;;  %v1380_v27 = vld [vmem:[#allocation2 + $0x110] ss:$8 sps:$4 sm:$0xff]  }
 0x402   :  { %v427_v31 = vpack.c.bf16 %v426_v30, %v425_v26  ;;  %v1378_v26 = vld [vmem:[#allocation2 + $0xf0] ss:$8 sps:$4 sm:$0xff]  }
 0x404   :  { %449 = vrot.lane.b32.xlu0 %v427_v31, %s1478_s17 }
 0x476   :  { %v450_v32 = vpop.permute.xlu0 %449 }
 0x477   :  { %1270 = vmatprep.subr.bf16.mxu0 %v450_v32 }
 0x478   :  { %1271 = vmatpush3.bf16.msra.mxu0 %v450_v32 }
 0x479   :  { %1290 = vmatprep.subr.bf16.mxu0 %v1476_v15 }
 0x47b   :  { %1273 = vmatmul.mubr.msk.bf16.vlgmr.msra.gmra.mrb[12].mxu0 %vm452_vm3, %v1590_v33 }
 0x47c   :  { %1276 = vmatprep.mubr.msk.bf16.mxu0 %vm452_vm3, %v1592_v34 }
 0x483   :  { %1277 = vmatmul.mubr.msk.bf16.gmra.mrb[16].mxu0 %vm452_vm3, %v1599_v35 }
 0x484   :  { %1298 = vmatprep.mubr.msk.bf16.mxu0 %vm1477_vm1, %v1476_v15 }
 0x54e   :  { %v1274_v37 = vpop.f32.mrb[12].mxu0 }
 0x54f   :  { %v499_v40 = vpop.f32.mrb[13].mxu0  ;;  %v601_v44 = vmul.f32 %v1274_v37, %v1608_v36 }
 0x550   :  { %v1275_v43 = vpop.f32.mrb[14].mxu0  ;;  %v599_v47 = vmul.f32 %v499_v40, %v1618_v39 }
 0x551   :  { %v602_v45 = vmul.f32 %v1275_v43, %v1613_v38  ;;  %v502_v46 = vpop.f32.mrb[15].mxu0 }
 0x552   :  { %v600_v48 = vmul.f32 %v502_v46, %v1623_v41 }
 0x553   :  { %v608_v49 = vpack.c.bf16 %v602_v45, %v601_v44 }
 0x554   :  { %v607_v50 = vpack.c.bf16 %v600_v48, %v599_v47 }
 0x555   :  { %v630_v4 = vsel %vm114_vm0, %v608_v49, 0 }
 0x556   :  { %v627_v53 = vsel %vm114_vm0, %v607_v50, 0  ;;  %v1278_v54 = vpop.f32.mrb[16].mxu0 }
 0x557   :  { %1291 = vmatpush3.bf16.xpose.msra.mxu0 %v627_v53  ;;  %v605_v56 = vmul.f32 %v1278_v54, %v1632_v51  ;;  %v515_v57 = vpop.f32.mrb[17].mxu0 }
 0x558   :  { %v603_v59 = vmul.f32 %v515_v57, %v1637_v52  ;;  %v1279_v60 = vpop.f32.mrb[18].mxu0  ;;  %1292 = vmatprep.subr.bf16.mxu0 %v1476_v15 }
 0x559   :  { %v606_v61 = vmul.f32 %v1279_v60, %v1643_v55  ;;  %v518_v62 = vpop.f32.mrb[19].mxu0 }
 0x55a   :  { %v604_v63 = vmul.f32 %v518_v62, %v1649_v58 }
 0x55b   :  { %v610_v2 = vpack.c.bf16 %v606_v61, %v605_v56 }
 0x55c   :  { %v609_v3 = vpack.c.bf16 %v604_v63, %v603_v59 }
 0x55d   :  { %v636_v6 = vsel %vm114_vm0, %v610_v2, 0  ;;  %v1382_v2 = vld [vmem:[#allocation2 + $0x130] ss:$8 sps:$4 sm:$0xff]  }
 0x55e   :  { %v633_v5 = vsel %vm114_vm0, %v609_v3, 0 }
 0x55f   :  { %1293 = vmatpush3.bf16.xpose.msra.mxu0 %v630_v4 }
 0x560   :  { %1294 = vmatprep.subr.bf16.mxu0 %v1476_v15 }
 0x567   :  { %1295 = vmatpush3.bf16.xpose.msra.mxu0 %v633_v5 }
 0x568   :  { %1296 = vmatprep.subr.bf16.mxu0 %v1476_v15 }
 0x56f   :  { %1297 = vmatpush3.bf16.xpose.msra.mxu0 %v636_v6 }
 0x570   :  { %1326 = vmatprep.subr.bf16.mxu0 %v1476_v15 }
 0x576   :  { %1299 = vmatmul.mubr.msk.bf16.vlgmr.msra.gmra.mrb[20].mxu0 %vm114_vm0, %v427_v31  ;;  %v1381_v31 = vld [vmem:[#allocation2 + $0x120] ss:$8 sps:$4 sm:$0xff]  }
 0x577   :  { %1330 = vmatprep.mubr.msk.bf16.mxu0 %vm1477_vm1, %v1476_v15  ;;  %1327 = vmatpush3.bf16.msra.mxu0 %v1381_v31  ;;  %v1480_v31 = vmov 0  }
 0x578   :  { %1328 = vmatprep.subr.bf16.mxu0 %v1476_v15 }
 0x57b   :  { %1329 = vmatpush3.bf16.msra.mxu0 %v1382_v2 }
 0x649   :  { %v672_v8 = vpop.f32.mrb[20].mxu0 }
 0x64a   :  { %v673_v10 = vadd.f32 %v672_v8, %v44_v7  ;;  %v1300_v11 = vpop.f32.mrb[21].mxu0  ;;  %v1149_v8 = vld [vmem:[%s1760_s1 + $0x4] ss:$0 sm:$0xff] }
 0x64b   :  { %v675_v12 = vpop.f32.mrb[22].mxu0 }
 0x64c   :  { %v676_v13 = vadd.f32 %v675_v12, %v45_v9  ;;  %v1301_v14 = vpop.f32.mrb[23].mxu0  ;;  %v679_v16 = vsel %vm236_vm2, %v673_v10, -inf }
 0x64d   :  { %680 = vmax.xlane.f32.xlu1 %v679_v16 }
 0x64e   :  { %v682_v17 = vsel %vm236_vm2, %v676_v13, -inf }
 0x651   :  { %683 = vmax.xlane.f32.xlu1 %v682_v17 }
 0x662   :  { %531 = vrot.lane.b32.xlu1 %v1556_v42, %s1479_s11  ;;  %v1379_v42 = vld [vmem:[#allocation2 + $0x100] ss:$8 sps:$4 sm:$0xff]  }
 0x6da   :  { %v681_v18 = vpop.xlane.xlu1 %680 }
 0x6db   :  { %v685_v21 = vsub.f32 %v673_v10, %v681_v18 }
 0x6dd   :  { %v687_v25 = vmul.f32 1.442695, %v685_v21 }
 0x6de   :  { %v684_v19 = vpop.xlane.xlu1 %683 }
 0x6df   :  { %v686_v20 = vsub.f32 %v676_v13, %v684_v19 }
 0x6e1   :  { %v689_v23 = vmul.f32 1.442695, %v686_v20 }
 0x6e2   :  { %v532_v22 = vpop.permute.xlu1 %531 }
 0x6e3   :  { %1280 = vmatprep.subr.bf16.mxu1 %v532_v22  ;;  %1405 = vpow2.f32 %v689_v23 }
 0x6e4   :  { %1281 = vmatpush3.bf16.msra.mxu1 %v532_v22  ;;  %1407 = vpow2.f32 %v687_v25 }
 0x6e5   :  { %1302 = vmatprep.subr.bf16.mxu1 %v1476_v15 }
 0x6e7   :  { %1283 = vmatmul.mubr.msk.bf16.vlgmr.msra.gmra.mrb[4].mxu1 %vm452_vm3, %v1590_v33 }
 0x6e8   :  { %1303 = vmatpush3.bf16.msra.mxu1 %v1377_v24  ;;  %1286 = vmatprep.mubr.msk.bf16.mxu1 %vm452_vm3, %v1592_v34 }
 0x6e9   :  { %1304 = vmatprep.subr.bf16.mxu1 %v1476_v15 }
 0x6ec   :  { %1305 = vmatpush3.bf16.msra.mxu1 %v1378_v26 }
 0x6ed   :  { %1306 = vmatprep.subr.bf16.mxu1 %v1476_v15  ;;  %v1406_v28 = vpop.eup %1405 }
 0x6ee   :  { %v1408_v29 = vpop.eup %1407 }
 0x6ef   :  { %1287 = vmatmul.mubr.msk.bf16.gmra.mrb[8].mxu1 %vm452_vm3, %v1599_v35  ;;  %v691_v30 = vpack.c.bf16 %v1406_v28, %v1408_v29 }
 0x6f0   :  { %1307 = vmatpush3.bf16.msra.mxu1 %v1379_v42  ;;  %1310 = vmatprep.mubr.msk.bf16.mxu1 %vm1477_vm1, %v1476_v15 }
 0x6f1   :  { %1308 = vmatprep.subr.bf16.mxu1 %v1476_v15 }
 0x6f4   :  { %1309 = vmatpush3.bf16.msra.mxu1 %v1380_v27  ;;  %v1385_v27 = vld [vmem:[#allocation2 + $0x144] ss:$8 sps:$4 sm:$0xff]  }
 0x6f5   :  { %1314 = vmatprep.subr.bf16.mxu1 %v1476_v15  ;;  %938 = vmatprep.subr.bf16.mxu0 %v1385_v27 }
 0x6f7   :  { %1311 = vmatmul.mubr.msk.bf16.vlgmr.msra.gmra.mrb[12].mxu1 %vm236_vm2, %v691_v30  ;;  %v1388_v30 = vld [vmem:[#allocation2 + $0x154] ss:$8 sps:$4 sm:$0xff]  }
 0x6f8   :  { %1322 = vmatprep.mubr.msk.bf16.mxu1 %vm1477_vm1, %v1476_v15 }
 0x7ba   :  { %v1284_v32 = vpop.f32.mrb[4].mxu1 }
 0x7bb   :  { %v568_v33 = vpop.f32.mrb[5].mxu1  ;;  %v613_v35 = vmul.f32 %v1284_v32, %v1608_v36 }
 0x7bc   :  { %v1285_v34 = vpop.f32.mrb[6].mxu1  ;;  %v611_v43 = vmul.f32 %v568_v33, %v1618_v39 }
 0x7bd   :  { %v614_v37 = vmul.f32 %v1285_v34, %v1613_v38  ;;  %v571_v40 = vpop.f32.mrb[7].mxu1 }
 0x7be   :  { %v612_v44 = vmul.f32 %v571_v40, %v1623_v41 }
 0x7bf   :  { %v620_v45 = vpack.c.bf16 %v614_v37, %v613_v35 }
 0x7c0   :  { %v619_v46 = vpack.c.bf16 %v612_v44, %v611_v43 }
 0x7c2   :  { %v1288_v47 = vpop.f32.mrb[8].mxu1  ;;  %1315 = vmatpush3.bf16.msra.mxu1 %v619_v46 }
 0x7c3   :  { %v584_v48 = vpop.f32.mrb[9].mxu1  ;;  %1316 = vmatprep.subr.bf16.mxu1 %v1476_v15  ;;  %v617_v50 = vmul.f32 %v1288_v47, %v1632_v51 }
 0x7c4   :  { %v1289_v49 = vpop.f32.mrb[10].mxu1  ;;  %v615_v38 = vmul.f32 %v584_v48, %v1637_v52 }
 0x7c5   :  { %v618_v53 = vmul.f32 %v1289_v49, %v1643_v55  ;;  %v587_v36 = vpop.f32.mrb[11].mxu1  ;;  %v1154_v49 = vld [vmem:[%s1760_s1 + $0x3] ss:$0 sm:$0xff] }
 0x7c6   :  { %v616_v54 = vmul.f32 %v587_v36, %v1649_v58  ;;  %1317 = vmatpush3.bf16.msra.mxu1 %v620_v45  ;;  %v1153_v45 = vld [vmem:[%s1760_s1 + $0x2] ss:$0 sm:$0xff] }
 0x7c7   :  { %v622_v39 = vpack.c.bf16 %v618_v53, %v617_v50  ;;  %1318 = vmatprep.subr.bf16.mxu1 %v1476_v15 }
 0x7c8   :  { %v621_v41 = vpack.c.bf16 %v616_v54, %v615_v38  ;;  %v1389_v54 = vld [vmem:[#allocation2 + $0x160] ss:$8 sps:$4 sm:$0xff]  }
 0x7ca   :  { %v753_v56 = vpop.f32.mrb[12].mxu1  ;;  %1319 = vmatpush3.bf16.msra.mxu1 %v621_v41  ;;  %v1391_v41 = vld [vmem:[#allocation2 + $0x180] ss:$8 sps:$4 sm:$0xff]  }
 0x7cb   :  { %vm760_vm4 = vcmp.eq.f32.partialorder %v753_v56, 0.0  ;;  %v1312_v57 = vpop.f32.mrb[13].mxu1  ;;  %1320 = vmatprep.subr.bf16.mxu1 %v1476_v15 }
 0x7cc   :  { %v762_v59 = vsel %vm760_vm4, 1.0, %v753_v56  ;;  %v756_v51 = vpop.f32.mrb[14].mxu1  ;;  %v1392_v56 = vld [vmem:[#allocation2 + $0x190] ss:$8 sps:$4 sm:$0xff]   ;;  %v1393_v57 = vld [vmem:[#allocation2 + $0x1a0] ss:$8 sps:$4 sm:$0xff]  }
 0x7cd   :  { %1409 = vrcp.f32 %v762_v59  ;;  %vm761_vm5 = vcmp.eq.f32.partialorder %v756_v51, 0.0  ;;  %v1313_v55 = vpop.f32.mrb[15].mxu1  ;;  %v1394_v59 = vld [vmem:[#allocation2 + $0x1b0] ss:$8 sps:$4 sm:$0xff]  }
 0x7ce   :  { %v763_v60 = vsel %vm761_vm5, 1.0, %v756_v51  ;;  %1321 = vmatpush3.bf16.msra.mxu1 %v622_v39  ;;  %v1390_v39 = vld [vmem:[#allocation2 + $0x170] ss:$8 sps:$4 sm:$0xff]   ;;  %v1395_v51 = vld [vmem:[#allocation2 + $0x1c0] ss:$8 sps:$4 sm:$0xff]  }
 0x7cf   :  { %1411 = vrcp.f32 %v763_v60  ;;  %1334 = vmatprep.subr.bf16.mxu1 %v1476_v15  ;;  %v1396_v55 = vld [vmem:[#allocation2 + $0x1d0] ss:$8 sps:$4 sm:$0xff]  }
 0x7d7   :  { %v1410_v52 = vpop.eup %1409 }
 0x7d8   :  { %v766_v61 = vmul.f32 %v1410_v52, %v1408_v29  ;;  %v1386_v29 = vld [vmem:[#allocation2 + $0x150] ss:$8 sps:$4 sm:$0xff]  }
 0x7d9   :  { %v1412_v58 = vpop.eup %1411 }
 0x7da   :  { %v767_v62 = vmul.f32 %v1412_v58, %v1406_v28  ;;  %v1383_v28 = vld [vmem:[#allocation2 + $0x140] ss:$8 sps:$4 sm:$0xff]  }
 0x7dc   :  { %v768_v63 = vpack.c.bf16 %v767_v62, %v766_v61 }
 0x7de   :  { %1323 = vmatmul.mubr.msk.bf16.vlgmr.msra.gmra.mrb[16].mxu1 %vm236_vm2, %v768_v63 }
 0x7df   :  { %1350 = vmatprep.mubr.msk.bf16.mxu1 %vm1477_vm1, %v1476_v15  ;;  %1335 = vmatpush3.bf16.msra.mxu1 %v1389_v54 }
 0x7e0   :  { %1336 = vmatprep.subr.bf16.mxu1 %v1476_v15 }
 0x7e3   :  { %1337 = vmatpush3.bf16.msra.mxu1 %v1390_v39 }
 0x7e4   :  { %1338 = vmatprep.subr.bf16.mxu1 %v1476_v15 }
 0x7e7   :  { %1339 = vmatpush3.bf16.msra.mxu1 %v1391_v41 }
 0x7e8   :  { %1340 = vmatprep.subr.bf16.mxu1 %v1476_v15 }
 0x7eb   :  { %1341 = vmatpush3.bf16.msra.mxu1 %v1392_v56 }
 0x7ec   :  { %1342 = vmatprep.subr.bf16.mxu1 %v1476_v15 }
 0x7ef   :  { %1343 = vmatpush3.bf16.msra.mxu1 %v1393_v57 }
 0x7f0   :  { %1344 = vmatprep.subr.bf16.mxu1 %v1476_v15 }
 0x7f3   :  { %1345 = vmatpush3.bf16.msra.mxu1 %v1394_v59 }
 0x7f4   :  { %1346 = vmatprep.subr.bf16.mxu1 %v1476_v15 }
 0x7f7   :  { %1347 = vmatpush3.bf16.msra.mxu1 %v1395_v51 }
 0x7f8   :  { %1348 = vmatprep.subr.bf16.mxu1 %v1476_v15 }
 0x7fb   :  { %1349 = vmatpush3.bf16.msra.mxu1 %v1396_v55 }
 0x8b1   :  { %v806_v3 = vpop.f32.mrb[16].mxu1 }
 0x8b2   :  { %v1324_v4 = vpop.f32.mrb[17].mxu1 }
 0x8b3   :  { %v809_v5 = vpop.f32.mrb[18].mxu1 }
 0x8b4   :  { %v813_v6 = vpack.c.bf16 %v809_v5, %v806_v3  ;;  %v1325_v7 = vpop.f32.mrb[19].mxu1 }
 0x8b6   :  { %1331 = vmatmul.mubr.msk.bf16.vlgmr.msra.gmra.mrb[24].mxu0 %vm114_vm0, %v813_v6 }
 0x8b7   :  { %939 = vmatpush1.bf16.msra.mxu0 %v1383_v28  ;;  %970 = vmatprep.mubr.bf16.mxu0 %v1480_v31 }
 0x8b8   :  { %940 = vmatprep.subr.bf16.mxu0 %v1388_v30 }
 0x8bb   :  { %941 = vmatpush1.bf16.msra.mxu0 %v1386_v29 }
 0x989   :  { %v867_v9 = vpop.f32.mrb[24].mxu0 }
 0x98a   :  { %v868_v10 = vadd.f32 %v1149_v8, %v867_v9  ;;  %v1332_v11 = vpop.f32.mrb[25].mxu0 }
 0x98b   :  { %v870_v12 = vpop.f32.mrb[26].mxu0 }
 0x98c   :  { %v1710_v13 = vadd.f32 %v868_v10, %v1520_v0  ;;  %v871_v14 = vadd.f32 %v1149_v8, %v870_v12  ;;  %v1333_v16 = vpop.f32.mrb[27].mxu0  ;;  %v1162_v12 = vld [vmem:[%s1760_s1 + $0x5] ss:$0 sm:$0xff] }
 0x98e   :  { %v1713_v17 = vadd.f32 %v871_v14, %v1525_v1  ;;  %v876_v18 = vsel %vm114_vm0, %v1710_v13, 0.0 }
 0x98f   :  { %877 = vadd.xlane.f32.xlu0 %v876_v18 }
 0x990   :  { %v879_v19 = vsel %vm114_vm0, %v1713_v17, 0.0 }
 0x991   :  { %880 = vadd.xlane.f32.xlu1 %v879_v19 }
 0xa1c   :  { %v878_v20 = vpop.xlane.xlu0 %877 }
 0xa1d   :  { %v882_v21 = vmul.f32 0.03125, %v878_v20 }
 0xa1e   :  { %v881_v22 = vpop.xlane.xlu1 %880 }
 0xa1f   :  { %v884_v23 = vsub.f32 %v1710_v13, %v882_v21  ;;  %v883_v0 = vmul.f32 0.03125, %v881_v22 }
 0xa21   :  { %v885_v24 = vsub.f32 %v1713_v17, %v883_v0  ;;  %v886_v25 = vmul.f32 %v884_v23, %v884_v23 }
 0xa23   :  { %v888_v1 = vsel %vm114_vm0, %v886_v25, 0.0  ;;  %v887_v26 = vmul.f32 %v885_v24, %v885_v24 }
 0xa24   :  { %889 = vadd.xlane.f32.xlu0 %v888_v1 }
 0xa25   :  { %v891_v42 = vsel %vm114_vm0, %v887_v26, 0.0 }
 0xa28   :  { %892 = vadd.xlane.f32.xlu0 %v891_v42 }
 0xab1   :  { %v890_v32 = vpop.xlane.xlu0 %889 }
 0xab2   :  { %v894_v33 = vmul.f32 0.03125, %v890_v32 }
 0xab4   :  { %v896_v34 = vadd.f32 1e-05, %v894_v33 }
 0xab5   :  { %v893_v35 = vpop.xlane.xlu0 %892 }
 0xab6   :  { %1413 = vrsqrt.f32 %v896_v34  ;;  %v895_v37 = vmul.f32 0.03125, %v893_v35 }
 0xab8   :  { %v897_v40 = vadd.f32 1e-05, %v895_v37 }
 0xaba   :  { %1415 = vrsqrt.f32 %v897_v40 }
 0xac0   :  { %v1414_v43 = vpop.eup %1413 }
 0xac1   :  { %v900_v44 = vmul.f32 %v1414_v43, %v884_v23 }
 0xac3   :  { %v906_v47 = vmul.f32 %v1153_v45, %v900_v44 }
 0xac4   :  { %v1416_v46 = vpop.eup %1415 }
 0xac5   :  { %v901_v48 = vmul.f32 %v1416_v46, %v885_v24  ;;  %v912_v53 = vadd.f32 %v1154_v49, %v906_v47 }
 0xac7   :  { %v907_v50 = vmul.f32 %v1153_v45, %v901_v48 }
 0xac9   :  { %v913_v36 = vadd.f32 %v1154_v49, %v907_v50 }
 0xacb   :  { %v914_v38 = vpack.c.bf16 %v913_v36, %v912_v53 }
 0xacd   :  { %1159 = vmatmul.mubr.msk.bf16.vlgmr.msra.gmra.mrb[28].mxu0 %vm114_vm0, %v914_v38 }
 0xba0   :  { %v972_v60 = vpop.f32.mrb[28].mxu0 }
 0xba1   :  { %v974_v52 = vpop.f32.mrb[29].mxu0 }
 0xba2   :  { %v1160_v58 = vmul.f32 -1.442695, %v974_v52  ;;  %v976_v61 = vpop.f32.mrb[30].mxu0 }
 0xba3   :  { %v978_v62 = vpop.f32.mrb[31].mxu0 }
 0xba4   :  { %1417 = vpow2.f32 %v1160_v58  ;;  %v1161_v63 = vmul.f32 -1.442695, %v978_v62 }
 0xba6   :  { %1419 = vpow2.f32 %v1161_v63 }
 0xbae   :  { %v1418_v2 = vpop.eup %1417 }
 0xbaf   :  { %v987_v3 = vadd.f32 1.0, %v1418_v2 }
 0xbb0   :  { %v1420_v4 = vpop.eup %1419 }
 0xbb1   :  { %1421 = vrcp.f32 %v987_v3  ;;  %v988_v5 = vadd.f32 1.0, %v1420_v4 }
 0xbb3   :  { %1423 = vrcp.f32 %v988_v5 }
 0xbbb   :  { %v1422_v6 = vpop.eup %1421 }
 0xbbc   :  { %v993_v7 = vmul.f32 %v1422_v6, %v974_v52 }
 0xbbd   :  { %v1424_v8 = vpop.eup %1423 }
 0xbbe   :  { %v995_v15 = vmul.f32 %v993_v7, %v972_v60  ;;  %v994_v9 = vmul.f32 %v1424_v8, %v978_v62 }
 0xbc0   :  { %v996_v10 = vmul.f32 %v994_v9, %v976_v61 }
 0xbc2   :  { %v997_v11 = vpack.c.bf16 %v996_v10, %v995_v15 }
 0xbc4   :  { %1351 = vmatmul.mubr.bf16.vlgmr.msra.gmra.mrb[20].mxu1 %v997_v11 }
 0xc97   :  { %v1084_v14 = vpop.f32.mrb[20].mxu1 }
 0xc98   :  { %v1085_v16 = vadd.f32 %v1162_v12, %v1084_v14  ;;  %v1352_v18 = vpop.f32.mrb[21].mxu1 }
 0xc99   :  { %v1087_v19 = vpop.f32.mrb[22].mxu1 }
 0xc9a   :  { %v1091_v20 = vadd.f32 %v1085_v16, %v1710_v13  ;;  %v1088_v21 = vadd.f32 %v1162_v12, %v1087_v19  ;;  %v1353_v22 = vpop.f32.mrb[23].mxu1 }
 0xc9c   :  { %1093 = vst.msk [vmem:[#allocation5] sm:$0xff] %vm114_vm0, %v1091_v20  ;;  %v1092_v23 = vadd.f32 %v1088_v21, %v1713_v17 }
 0xc9e   :  { %1094 = vst.msk [vmem:[#allocation5 + $0x8] sm:$0xff] %vm114_vm0, %v1092_v23 }
 0xc9f   :  { %1458 = shalt.err (!%p1455_p12)
}
 0xca0   :  { %s1459_s26 = scalar_lea.hbm %s1762_s3, 256 }
 0xca1   :  { %p1460_p13 = scmp.ne.s32.totalorder %s1762_s3, %s1459_s26  ;;  %p1463_p0 = scmp.lt.u32.totalorder %s1459_s26, %s1762_s3 }
 0xca3   :  { %p1465_p1 = pnand %p1463_p0, %p1460_p13 }
 0xca5   :  { %1468 = shalt.err (!%p1465_p1)
}
 0xca6   :  { %1106 = dma.vmem_to_hbm [thread:$0]  %s1101_s21, 256, %s1762_s3, [#allocation4], %s1474_s22, %s1474_s22, %s1475_s23  }
 0xca7   :  { %1471 = dma.done.wait [#allocation4], 256  }
 0xca8   :  { %1472 = vsyncadd [#allocation4], 4294967040 }
 0xca9   :  { %1110 = vsyncpa [#allocation3], 1 }
 0xcaa   :  { %1111 = vsyncpa [#allocation4], 1 }

</bundles_post_ra>
